<compile_context>
chip_gen: v5e
topology: v5e:2x2
jax: 0.10.0
libtpu: 0.0.40
codegen_flags: <defaults>
</compile_context>

<pallas_src>
import numpy as np
import jax
import jax.numpy as jnp
from jax.experimental import pallas as pl
from jax.experimental.pallas import tpu as pltpu

N_GROUP = 3                      # SO(3): 3x3 matrices
REP_INDEX = 2                    # irrep l = 2
REP_DIM = 2 * REP_INDEX + 1      # 5
D2 = REP_DIM ** 2                # 25 translations
MAX_TILE_N = 8192                # rows per grid step (f32 VMEM use ~16 MiB double-buffered)


def _round_up(a, b):
    return (a + b - 1) // b * b


def _character_from_cos(c, ell, xp):
    """chi_l(theta) = 1 + 2*sum_{m=1..l} cos(m theta), with c = cos(theta).
    cos(m theta) = T_m(c) via the Chebyshev recurrence (static unroll)."""
    chi = xp.ones_like(c)
    t_prev = xp.ones_like(c)
    t_cur = c
    for m in range(1, ell + 1):
        if m > 1:
            t_prev, t_cur = t_cur, 2.0 * c * t_cur - t_prev
        chi = chi + 2.0 * t_cur
    return chi


def _random_rotations(key, count):
    """Deterministic random SO(3) elements (QR of Gaussian, det fixed to +1)."""
    a = jax.random.normal(key, (count, N_GROUP, N_GROUP))
    q, _ = jnp.linalg.qr(a)
    det = jnp.linalg.det(q)
    q = q.at[:, :, -1].multiply(jnp.where(det < 0, -1.0, 1.0)[:, None])
    return q


def init_translated_characters_basis(key):
    """Deterministic parameter init mirroring TranslatedCharactersBasis.__init__.
    Host-side NumPy float64 glue (Gram / Cholesky / inverse); parameters only."""
    attempts = 0
    while True:
        attempts += 1
        key, sub = jax.random.split(key)
        translations = np.asarray(_random_rotations(sub, D2), dtype=np.float64)  # [D2,3,3]
        # pairwise_embed: torus representative of t_i @ t_j^{-1}  (t_j^{-1} = t_j.T)
        prod = np.einsum("iab,jcb->ijac", translations, translations)
        tr = np.trace(prod, axis1=-2, axis2=-1)
        c = (tr - 1.0) / 2.0
        gram = _character_from_cos(c, REP_INDEX, np)              # [D2, D2]
        try:
            chol = np.linalg.cholesky(gram)
            coeffs = np.linalg.inv(chol)
            break
        except np.linalg.LinAlgError:
            # TODO(synk): original retries with fresh random translations; same here.
            if attempts >= 3:
                raise
    return (jnp.asarray(translations, dtype=jnp.float32),
            jnp.asarray(coeffs, dtype=jnp.float32))


def _basis_kernel(xf_ref, tft_ref, coeffst_ref, out_ref):
    # traces[b, s] = trace(T_s @ X_b) = <vec(T_s^T), vec(X_b)>  -> one MXU matmul (K=9)
    traces = jnp.dot(xf_ref[...], tft_ref[...],
                     preferred_element_type=jnp.float32)          # [TILE_N, D2]
    # chi_2((tr - 1)/2) = 1 + 2*cos(th) + 2*cos(2*th) == tr^2 - tr - 1 (closed form)
    chi = traces * traces - traces - 1.0
    # torch.matmul(coeffs, characters.T).T == characters @ coeffs.T
    out_ref[...] = jnp.dot(chi, coeffst_ref[...],
                           preferred_element_type=jnp.float32).astype(out_ref.dtype)


def translated_characters_basis_forward(x, translations, coeffs, *, max_tile_n=MAX_TILE_N):
    """x: [N, 3, 3] rotation matrices.  Returns [N, D2] float32."""
    n = x.shape[0]
    nn = N_GROUP * N_GROUP

    # vec(X_b), row-major: a free, contiguous reshape (no batch-sized transpose pass).
    xf = x.reshape(n, nn).astype(jnp.float32)                                  # [N, 9]
    # Column s of tft is vec(T_s^T); the transpose lives on the tiny constant.
    tft = jnp.transpose(translations, (0, 2, 1)).reshape(D2, nn).T.astype(jnp.float32)  # [9, D2]
    coeffst = coeffs.T.astype(jnp.float32)                                     # [D2, D2]
    # TODO(synk): optionally cast xf/tft to bfloat16 (f32 accumulate) to halve the
    # input HBM read on this bandwidth-bound kernel; kept f32 to match torch numerics.

    tile_n = min(max_tile_n, _round_up(max(n, 1), 128))
    n_pad = _round_up(n, tile_n)
    if n_pad != n:
        xf = jnp.pad(xf, ((0, n_pad - n), (0, 0)))                             # tail padding

    out = pl.pallas_call(
        _basis_kernel,
        out_shape=jax.ShapeDtypeStruct((n_pad, D2), jnp.float32),
        grid=(n_pad // tile_n,),
        in_specs=[pl.BlockSpec((tile_n, nn), lambda i: (i, 0)),   # batch tile
                  pl.BlockSpec((nn, D2), lambda i: (0, 0)),       # resident constant
                  pl.BlockSpec((D2, D2), lambda i: (0, 0))],      # resident constant
        out_specs=pl.BlockSpec((tile_n, D2), lambda i: (i, 0)),
        compiler_params=pltpu.CompilerParams(
            dimension_semantics=("parallel",),                    # megacore on v7x
            vmem_limit_bytes=32 * 1024 * 1024),                   # explicit for v7x/v5e
    )(xf, tft, coeffst)
    return out[:n]


if __name__ == "__main__":
    key = jax.random.PRNGKey(0)
    k_param, k_x = jax.random.split(key)

    translations, coeffs = init_translated_characters_basis(k_param)   # [25,3,3], [25,25]
    x = _random_rotations(k_x, 16)                                     # batch of 16 SO(3) elems

    out = translated_characters_basis_forward(x, translations, coeffs)
    jax.block_until_ready(out)
    assert out.shape == (16, D2) and out.dtype == jnp.float32
    assert bool(jnp.all(jnp.isfinite(out)))

    # Pure-JAX reference of the torch forward (loose tolerance for MXU rounding).
    xt = jnp.einsum("tij,bjk->btik", translations, x)                  # T_t @ X_b
    tr = jnp.trace(xt, axis1=-2, axis2=-1)
    chi_ref = _character_from_cos((tr - 1.0) / 2.0, REP_INDEX, jnp)
    ref = chi_ref @ coeffs.T
    rel_err = float(jnp.max(jnp.abs(out - ref)) / (jnp.max(jnp.abs(ref)) + 1e-6))
    assert rel_err < 5e-2, rel_err

    print("KERNEL_OK")
</pallas_src>

<mosaic_0001>
module attributes {stable_mosaic.version = 11 : i64} {
  func.func @_basis_kernel(%arg0: i32, %arg1: memref<128x9xf32, #tpu.memory_space<vmem>>, %arg2: memref<9x25xf32, #tpu.memory_space<vmem>>, %arg3: memref<25x25xf32, #tpu.memory_space<vmem>>, %arg4: memref<128x25xf32, #tpu.memory_space<vmem>>) attributes {dimension_semantics = [#tpu.dimension_semantics<parallel>], iteration_bounds = array<i64: 1>, scalar_prefetch = 0 : i64, scratch_operands = 0 : i64, tpu.core_type = #tpu.core_type<tc>, window_params = [{transform_indices = @transform_0, window_bounds = array<i64: 128, 9>}, {pipeline_mode = #tpu.pipeline_mode<synchronous>, transform_indices = @transform_1, window_bounds = array<i64: 9, 25>}, {pipeline_mode = #tpu.pipeline_mode<synchronous>, transform_indices = @transform_2, window_bounds = array<i64: 25, 25>}, {transform_indices = @transform_3, window_bounds = array<i64: 128, 25>}]} {
    %c0 = arith.constant 0 : index
    %c0_0 = arith.constant 0 : index
    %0 = vector.load %arg1[%c0, %c0_0] : memref<128x9xf32, #tpu.memory_space<vmem>>, vector<128x9xf32>
    %c0_1 = arith.constant 0 : index
    %c0_2 = arith.constant 0 : index
    %1 = vector.load %arg2[%c0_1, %c0_2] : memref<9x25xf32, #tpu.memory_space<vmem>>, vector<9x25xf32>
    %cst = arith.constant dense<0.000000e+00> : vector<128x25xf32>
    %2 = tpu.matmul %0, %1, %cst {dimension_numbers = #tpu.dot_dimension_numbers<[1], [0], [0], [1], [0, 0, 1, 1], [], []>} : vector<128x9xf32>, vector<9x25xf32>, vector<128x25xf32> -> vector<128x25xf32>
    %3 = arith.mulf %2, %2 : vector<128x25xf32>
    %4 = arith.subf %3, %2 : vector<128x25xf32>
    %cst_3 = arith.constant 1.000000e+00 : f32
    %5 = vector.broadcast %cst_3 : f32 to vector<128x25xf32>
    %6 = arith.subf %4, %5 : vector<128x25xf32>
    %c0_4 = arith.constant 0 : index
    %c0_5 = arith.constant 0 : index
    %7 = vector.load %arg3[%c0_4, %c0_5] : memref<25x25xf32, #tpu.memory_space<vmem>>, vector<25x25xf32>
    %cst_6 = arith.constant dense<0.000000e+00> : vector<128x25xf32>
    %8 = tpu.matmul %6, %7, %cst_6 {dimension_numbers = #tpu.dot_dimension_numbers<[1], [0], [0], [1], [0, 0, 1, 1], [], []>} : vector<128x25xf32>, vector<25x25xf32>, vector<128x25xf32> -> vector<128x25xf32>
    %c0_7 = arith.constant 0 : index
    %c0_8 = arith.constant 0 : index
    %9 = vector.load %arg4[%c0_7, %c0_8] : memref<128x25xf32, #tpu.memory_space<vmem>>, vector<128x25xf32>
    tpu.vector_store %arg4[%c0_7, %c0_8], %8 {strides = array<i32>} : memref<128x25xf32, #tpu.memory_space<vmem>>, vector<128x25xf32>,
    return
  }
  func.func @transform_0(%arg0: i32) -> (i32, i32) {
    %c0_i32 = arith.constant 0 : i32
    %c0_i32_0 = arith.constant 0 : i32
    return %arg0, %c0_i32 : i32, i32
  }
  func.func @transform_1(%arg0: i32) -> (i32, i32) {
    %c0_i32 = arith.constant 0 : i32
    %c0_i32_0 = arith.constant 0 : i32
    %c0_i32_1 = arith.constant 0 : i32
    return %c0_i32, %c0_i32_0 : i32, i32
  }
  func.func @transform_2(%arg0: i32) -> (i32, i32) {
    %c0_i32 = arith.constant 0 : i32
    %c0_i32_0 = arith.constant 0 : i32
    %c0_i32_1 = arith.constant 0 : i32
    return %c0_i32, %c0_i32_0 : i32, i32
  }
  func.func @transform_3(%arg0: i32) -> (i32, i32) {
    %c0_i32 = arith.constant 0 : i32
    %c0_i32_0 = arith.constant 0 : i32
    return %arg0, %c0_i32 : i32, i32
  }
}

</mosaic_0001>

<bundles_post_ra>
// kernel: tpu_custom_call.1
= control target key start
LH: loop header
LB: loop body
LE: loop exit
PB: predicated region body
PF: predicated region fallthrough
CT: control target
= control target key end

     0   :  { %vm81_vm0 = vcmask 1040384   ;;  %vm32_vm1 = vcmask 72704   ;;  %vm202_vm2 = vcmask 203776   ;;  %s581_s1 = inlined_call_operand.vmem [shape: f32[9,25], index: 1, kind: input, shape index: {}]   ;;  %s582_s0 = inlined_call_operand.vmem [shape: f32[128,9], index: 0, kind: input, shape index: {}]   ;;  %s583_s2 = inlined_call_operand.vmem [shape: f32[25,25], index: 2, kind: input, shape index: {}]   ;;  %s584_s3 = inlined_call_operand.vmem [shape: f32[128,25], index: 3, kind: output, shape index: {}]  }
   0x1   :  { %v31_v0 = vld [vmem:[%s581_s1 + $0x8] sm:$0x1]  ;;  %v30_v1 = vld [vmem:[%s581_s1] sm:$0xff]  ;;  %v16_v4 = vld [vmem:[%s582_s0 + $0x10] sm:$0xff] }
   0x2   :  { %339 = vmatpush.msk.msra.mxu0 %vm81_vm0, %v31_v0  ;;  %v14_v2 = vld [vmem:[%s582_s0] sm:$0xff]  ;;  %389 = vmatpush.msk.msra.mxu3 %vm81_vm0, %v31_v0  ;;  %v15_v3 = vld [vmem:[%s582_s0 + $0x8] sm:$0xff]  ;;  %v17_v5 = vld [vmem:[%s582_s0 + $0x18] sm:$0xff] }
   0x3   :  { %v18_v6 = vld [vmem:[%s582_s0 + $0x20] sm:$0xff]  ;;  %v23_v7 = vld [vmem:[%s582_s0 + $0x48] sm:$0xff]  ;;  %v24_v9 = vld [vmem:[%s582_s0 + $0x50] sm:$0xff] }
   0x4   :  { %100 = vmatpush.msra.mxu0 %v30_v1  ;;  %390 = vmatpush.msra.mxu3 %v30_v1  ;;  %v19_v8 = vld [vmem:[%s582_s0 + $0x28] sm:$0xff]  ;;  %v20_v10 = vld [vmem:[%s582_s0 + $0x30] sm:$0xff]  ;;  %v25_v11 = vld [vmem:[%s582_s0 + $0x58] sm:$0xff] }
   0x5   :  { %340 = vmatmul.msk.f32.vlgmr.msra.gmra.mxu0 %vm32_vm1, %v14_v2  ;;  %349 = vmatmul.msk.f32.vlgmr.msra.gmra.mxu3 %vm32_vm1, %v23_v7  ;;  %v21_v12 = vld [vmem:[%s582_s0 + $0x38] sm:$0xff]  ;;  %v26_v13 = vld [vmem:[%s582_s0 + $0x60] sm:$0xff]  ;;  %v27_v15 = vld [vmem:[%s582_s0 + $0x68] sm:$0xff] }
   0x6   :  { %v22_v14 = vld [vmem:[%s582_s0 + $0x40] sm:$0xff]  ;;  %v28_v16 = vld [vmem:[%s582_s0 + $0x70] sm:$0xff]  ;;  %v29_v17 = vld [vmem:[%s582_s0 + $0x78] sm:$0xff] }
   0x7   :  { %v201_v18 = vld [vmem:[%s583_s2 + $0x18] sm:$0x1]  ;;  %v200_v19 = vld [vmem:[%s583_s2 + $0x10] sm:$0xff]  ;;  %v199_v20 = vld [vmem:[%s583_s2 + $0x8] sm:$0xff] }
   0x8   :  { %372 = vmatpush.msk.msra.mxu1 %vm81_vm0, %v201_v18  ;;  %391 = vmatpush.msk.msra.mxu2 %vm81_vm0, %v201_v18  ;;  %v198_v21 = vld [vmem:[%s583_s2] sm:$0xff] }
   0xa   :  { %267 = vmatpush.msra.mxu1 %v200_v19  ;;  %392 = vmatpush.msra.mxu2 %v200_v19 }
   0xc   :  { %268 = vmatpush.msra.mxu1 %v199_v20  ;;  %393 = vmatpush.msra.mxu2 %v199_v20 }
   0xd   :  { %341 = vmatmul.msk.f32.gmra.mxu0 %vm32_vm1, %v15_v3  ;;  %350 = vmatmul.msk.f32.gmra.mxu3 %vm32_vm1, %v24_v9 }
   0xe   :  { %269 = vmatpush.msra.mxu1 %v198_v21  ;;  %394 = vmatpush.msra.mxu2 %v198_v21 }
  0x15   :  { %342 = vmatmul.msk.f32.gmra.mxu0 %vm32_vm1, %v16_v4  ;;  %351 = vmatmul.msk.f32.gmra.mxu3 %vm32_vm1, %v25_v11 }
  0x1d   :  { %343 = vmatmul.msk.f32.gmra.mxu0 %vm32_vm1, %v17_v5  ;;  %352 = vmatmul.msk.f32.gmra.mxu3 %vm32_vm1, %v26_v13 }
  0x25   :  { %344 = vmatmul.msk.f32.gmra.mxu0 %vm32_vm1, %v18_v6  ;;  %353 = vmatmul.msk.f32.gmra.mxu3 %vm32_vm1, %v27_v15 }
  0x2d   :  { %345 = vmatmul.msk.f32.gmra.mxu0 %vm32_vm1, %v19_v8  ;;  %354 = vmatmul.msk.f32.gmra.mxu3 %vm32_vm1, %v28_v16 }
  0x35   :  { %346 = vmatmul.msk.f32.gmra.mxu0 %vm32_vm1, %v20_v10  ;;  %355 = vmatmul.msk.f32.gmra.mxu3 %vm32_vm1, %v29_v17 }
  0x3d   :  { %347 = vmatmul.msk.f32.gmra.mxu0 %vm32_vm1, %v21_v12 }
  0x45   :  { %348 = vmatmul.msk.f32.gmra.mxu0 %vm32_vm1, %v22_v14 }
  0x82   :  { %v102_v22 = vpop.f32.mrf.mxu0 }
  0x83   :  { %v150_v23 = vmul.f32 %v102_v22, %v102_v22 }
  0x85   :  { %v166_v24 = vsub.f32 %v150_v23, %v102_v22 }
  0x87   :  { %v356_v25 = vadd.f32 -1.0, %v166_v24 }
  0x88   :  { %v129_v50 = vpop.f32.mrf.mxu3 }
  0x89   :  { %373 = vmatmul.msk.f32.vlgmr.msra.gmra.mxu1 %vm202_vm2, %v356_v25  ;;  %v159_v60 = vmul.f32 %v129_v50, %v129_v50 }
  0x8a   :  { %v105_v26 = vpop.f32.mrf.mxu0 }
  0x8b   :  { %v151_v27 = vmul.f32 %v105_v26, %v105_v26  ;;  %v175_v61 = vsub.f32 %v159_v60, %v129_v50 }
  0x8d   :  { %v167_v28 = vsub.f32 %v151_v27, %v105_v26  ;;  %v365_v63 = vadd.f32 -1.0, %v175_v61 }
  0x8f   :  { %v357_v29 = vadd.f32 -1.0, %v167_v28 }
  0x90   :  { %v132_v56 = vpop.f32.mrf.mxu3 }
  0x91   :  { %374 = vmatmul.msk.f32.gmra.mxu1 %vm202_vm2, %v357_v29  ;;  %v160_v0 = vmul.f32 %v132_v56, %v132_v56 }
  0x92   :  { %v108_v30 = vpop.f32.mrf.mxu0 }
  0x93   :  { %v152_v31 = vmul.f32 %v108_v30, %v108_v30  ;;  %v176_v1 = vsub.f32 %v160_v0, %v132_v56 }
  0x95   :  { %v168_v32 = vsub.f32 %v152_v31, %v108_v30  ;;  %v366_v3 = vadd.f32 -1.0, %v176_v1 }
  0x97   :  { %v358_v33 = vadd.f32 -1.0, %v168_v32 }
  0x98   :  { %v135_v62 = vpop.f32.mrf.mxu3 }
  0x99   :  { %375 = vmatmul.msk.f32.gmra.mxu1 %vm202_vm2, %v358_v33  ;;  %v161_v4 = vmul.f32 %v135_v62, %v135_v62 }
  0x9a   :  { %v111_v34 = vpop.f32.mrf.mxu0 }
  0x9b   :  { %v153_v35 = vmul.f32 %v111_v34, %v111_v34  ;;  %v177_v5 = vsub.f32 %v161_v4, %v135_v62 }
  0x9d   :  { %v169_v36 = vsub.f32 %v153_v35, %v111_v34  ;;  %v367_v6 = vadd.f32 -1.0, %v177_v5 }
  0x9f   :  { %v359_v37 = vadd.f32 -1.0, %v169_v36 }
  0xa0   :  { %v138_v2 = vpop.f32.mrf.mxu3 }
  0xa1   :  { %376 = vmatmul.msk.f32.gmra.mxu1 %vm202_vm2, %v359_v37  ;;  %v162_v7 = vmul.f32 %v138_v2, %v138_v2 }
  0xa2   :  { %v114_v38 = vpop.f32.mrf.mxu0 }
  0xa3   :  { %v154_v39 = vmul.f32 %v114_v38, %v114_v38  ;;  %v178_v9 = vsub.f32 %v162_v7, %v138_v2 }
  0xa5   :  { %v170_v40 = vsub.f32 %v154_v39, %v114_v38  ;;  %v368_v10 = vadd.f32 -1.0, %v178_v9 }
  0xa7   :  { %v360_v41 = vadd.f32 -1.0, %v170_v40 }
  0xa8   :  { %v141_v8 = vpop.f32.mrf.mxu3 }
  0xa9   :  { %377 = vmatmul.msk.f32.gmra.mxu1 %vm202_vm2, %v360_v41  ;;  %v163_v11 = vmul.f32 %v141_v8, %v141_v8 }
  0xaa   :  { %v117_v42 = vpop.f32.mrf.mxu0 }
  0xab   :  { %v155_v43 = vmul.f32 %v117_v42, %v117_v42  ;;  %v179_v13 = vsub.f32 %v163_v11, %v141_v8 }
  0xad   :  { %v171_v44 = vsub.f32 %v155_v43, %v117_v42  ;;  %v369_v14 = vadd.f32 -1.0, %v179_v13 }
  0xaf   :  { %v361_v45 = vadd.f32 -1.0, %v171_v44 }
  0xb0   :  { %v144_v12 = vpop.f32.mrf.mxu3 }
  0xb1   :  { %378 = vmatmul.msk.f32.gmra.mxu1 %vm202_vm2, %v361_v45  ;;  %v164_v15 = vmul.f32 %v144_v12, %v144_v12 }
  0xb2   :  { %v120_v46 = vpop.f32.mrf.mxu0 }
  0xb3   :  { %v156_v47 = vmul.f32 %v120_v46, %v120_v46  ;;  %v180_v16 = vsub.f32 %v164_v15, %v144_v12 }
  0xb5   :  { %v172_v48 = vsub.f32 %v156_v47, %v120_v46  ;;  %v370_v18 = vadd.f32 -1.0, %v180_v16 }
  0xb7   :  { %v362_v49 = vadd.f32 -1.0, %v172_v48 }
  0xb8   :  { %v147_v17 = vpop.f32.mrf.mxu3 }
  0xb9   :  { %379 = vmatmul.msk.f32.gmra.mxu1 %vm202_vm2, %v362_v49  ;;  %v165_v19 = vmul.f32 %v147_v17, %v147_v17 }
  0xba   :  { %v123_v51 = vpop.f32.mrf.mxu0 }
  0xbb   :  { %v157_v52 = vmul.f32 %v123_v51, %v123_v51  ;;  %v181_v20 = vsub.f32 %v165_v19, %v147_v17 }
  0xbd   :  { %v173_v53 = vsub.f32 %v157_v52, %v123_v51  ;;  %v371_v21 = vadd.f32 -1.0, %v181_v20 }
  0xbf   :  { %v363_v54 = vadd.f32 -1.0, %v173_v53 }
  0xc1   :  { %380 = vmatmul.msk.f32.gmra.mxu1 %vm202_vm2, %v363_v54 }
  0xc2   :  { %v126_v55 = vpop.f32.mrf.mxu0 }
  0xc3   :  { %v158_v57 = vmul.f32 %v126_v55, %v126_v55 }
  0xc5   :  { %v174_v58 = vsub.f32 %v158_v57, %v126_v55 }
  0xc7   :  { %v364_v59 = vadd.f32 -1.0, %v174_v58 }
  0xc9   :  { %381 = vmatmul.msk.f32.vlgmr.msra.gmra.mxu2 %vm202_vm2, %v364_v59 }
  0xd1   :  { %382 = vmatmul.msk.f32.gmra.mxu2 %vm202_vm2, %v365_v63 }
  0xd9   :  { %383 = vmatmul.msk.f32.gmra.mxu2 %vm202_vm2, %v366_v3 }
  0xe1   :  { %384 = vmatmul.msk.f32.gmra.mxu2 %vm202_vm2, %v367_v6 }
  0xe9   :  { %385 = vmatmul.msk.f32.gmra.mxu2 %vm202_vm2, %v368_v10 }
  0xf1   :  { %386 = vmatmul.msk.f32.gmra.mxu2 %vm202_vm2, %v369_v14 }
  0xf9   :  { %387 = vmatmul.msk.f32.gmra.mxu2 %vm202_vm2, %v370_v18 }
 0x101   :  { %388 = vmatmul.msk.f32.gmra.mxu2 %vm202_vm2, %v371_v21 }
 0x106   :  { %v271_v22 = vpop.f32.mrf.mxu1 }
 0x107   :  { %319 = vst.msk [vmem:[%s584_s3] sm:$0xff] %vm202_vm2, %v271_v22 }
 0x10e   :  { %v274_v23 = vpop.f32.mrf.mxu1 }
 0x10f   :  { %320 = vst.msk [vmem:[%s584_s3 + $0x8] sm:$0xff] %vm202_vm2, %v274_v23 }
 0x116   :  { %v277_v24 = vpop.f32.mrf.mxu1 }
 0x117   :  { %321 = vst.msk [vmem:[%s584_s3 + $0x10] sm:$0xff] %vm202_vm2, %v277_v24 }
 0x11e   :  { %v280_v25 = vpop.f32.mrf.mxu1 }
 0x11f   :  { %322 = vst.msk [vmem:[%s584_s3 + $0x18] sm:$0xff] %vm202_vm2, %v280_v25 }
 0x126   :  { %v283_v26 = vpop.f32.mrf.mxu1 }
 0x127   :  { %323 = vst.msk [vmem:[%s584_s3 + $0x20] sm:$0xff] %vm202_vm2, %v283_v26 }
 0x12e   :  { %v286_v27 = vpop.f32.mrf.mxu1 }
 0x12f   :  { %324 = vst.msk [vmem:[%s584_s3 + $0x28] sm:$0xff] %vm202_vm2, %v286_v27 }
 0x136   :  { %v289_v28 = vpop.f32.mrf.mxu1 }
 0x137   :  { %325 = vst.msk [vmem:[%s584_s3 + $0x30] sm:$0xff] %vm202_vm2, %v289_v28 }
 0x13e   :  { %v292_v29 = vpop.f32.mrf.mxu1 }
 0x13f   :  { %326 = vst.msk [vmem:[%s584_s3 + $0x38] sm:$0xff] %vm202_vm2, %v292_v29 }
 0x14c   :  { %v295_v30 = vpop.f32.mrf.mxu2 }
 0x14d   :  { %327 = vst.msk [vmem:[%s584_s3 + $0x40] sm:$0xff] %vm202_vm2, %v295_v30 }
 0x154   :  { %v298_v31 = vpop.f32.mrf.mxu2 }
 0x155   :  { %328 = vst.msk [vmem:[%s584_s3 + $0x48] sm:$0xff] %vm202_vm2, %v298_v31 }
 0x15c   :  { %v301_v32 = vpop.f32.mrf.mxu2 }
 0x15d   :  { %329 = vst.msk [vmem:[%s584_s3 + $0x50] sm:$0xff] %vm202_vm2, %v301_v32 }
 0x164   :  { %v304_v33 = vpop.f32.mrf.mxu2 }
 0x165   :  { %330 = vst.msk [vmem:[%s584_s3 + $0x58] sm:$0xff] %vm202_vm2, %v304_v33 }
 0x16c   :  { %v307_v34 = vpop.f32.mrf.mxu2 }
 0x16d   :  { %331 = vst.msk [vmem:[%s584_s3 + $0x60] sm:$0xff] %vm202_vm2, %v307_v34 }
 0x174   :  { %v310_v35 = vpop.f32.mrf.mxu2 }
 0x175   :  { %332 = vst.msk [vmem:[%s584_s3 + $0x68] sm:$0xff] %vm202_vm2, %v310_v35 }
 0x17c   :  { %v313_v36 = vpop.f32.mrf.mxu2 }
 0x17d   :  { %333 = vst.msk [vmem:[%s584_s3 + $0x70] sm:$0xff] %vm202_vm2, %v313_v36 }
 0x184   :  { %v316_v37 = vpop.f32.mrf.mxu2 }
 0x185   :  { %334 = vst.msk [vmem:[%s584_s3 + $0x78] sm:$0xff] %vm202_vm2, %v316_v37 }

</bundles_post_ra>
